<compile_context>
chip_gen: v7x
topology: tpu7x:2x2x1
jax: 0.10.0
libtpu: 0.0.40
codegen_flags: <defaults>
</compile_context>

<pallas_src>
import functools

import jax
import jax.numpy as jnp
from jax import lax
from jax.experimental import pallas as pl
from jax.experimental.pallas import tpu as pltpu


def _kld_kernel(px_ref, tx_ref, py_ref, ty_ref, w_ref, out_ref, *,
                total_rows, include_target_entropy):
    """One grid step: rows_blk joint-rows of both branches -> scalar partial."""
    rows_blk = px_ref.shape[0]
    row0 = pl.program_id(0) * rows_blk

    def branch(p_ref, t_ref):
        # Inputs stream in native (possibly bf16) dtype; upcast in-kernel.
        p = p_ref[...].astype(jnp.float32)            # (rows_blk, L)
        t = t_ref[...].astype(jnp.float32)            # (rows_blk, L)
        num_bins = p.shape[-1]
        # Reduce on the fly (no full-size `s = p - lse` / `kl` temporaries):
        #   sum_bins KL(t || softmax(p)) = sum t*log t - sum t*p + lse * sum t
        m = jnp.max(p, axis=-1, keepdims=True)                           # (r,1)
        lse = jnp.log(jnp.sum(jnp.exp(p - m), axis=-1, keepdims=True)) + m
        sum_t = jnp.sum(t, axis=-1, keepdims=True)
        sum_tp = jnp.sum(t * p, axis=-1, keepdims=True)
        per_row = lse * sum_t - sum_tp
        if include_target_entropy:
            # xlogy(t, t): prediction-independent entropy term of nn.KLDivLoss.
            t_logt = jnp.where(t > 0.0,
                               t * jnp.log(jnp.where(t > 0.0, t, 1.0)), 0.0)
            per_row = per_row + jnp.sum(t_logt, axis=-1, keepdims=True)
        return per_row * (1.0 / num_bins)             # mean over bins -> (r,1)

    f = branch(px_ref, tx_ref) + branch(py_ref, ty_ref)       # (rows_blk, 1)

    # Ragged last block: zero rows past total_rows (NaN/garbage safe, since
    # jnp.where selects). Statically elided when blocks tile R exactly.
    if total_rows % rows_blk != 0:
        rid = lax.broadcasted_iota(jnp.int32, f.shape, 0) + row0
        f = jnp.where(rid < total_rows, f, 0.0)

    # Lane-dense weight row; lanes past R are already zero (wrapper pads).
    w = w_ref[...].astype(jnp.float32)                        # (1, rows_blk)
    # Weighted row reduction as a (1,rows)x(rows,1) matmul on the idle MXU.
    partial = jnp.dot(w, f, preferred_element_type=jnp.float32)[0, 0]
    out_ref[...] = jnp.full(out_ref.shape, partial, out_ref.dtype)


def kl_discret_loss(output_x, output_y, target_x, target_y, target_weight,
                    *, rows_per_block=None, include_target_entropy=True):
    """SimDR KLDiscretLoss forward (is_3d=False path).

    output_*: (B, J, L*) logits; target_*: (B, J, L*) soft labels;
    target_weight: (B, J) (or (B, J, 1)). Returns a float32 scalar equal to
    the PyTorch module's value (when include_target_entropy=True).
    """
    B, J, Lx = output_x.shape
    Ly = output_y.shape[-1]
    R = B * J
    auto_rows = rows_per_block is None

    # Pure reshapes (bins already last -> lane axis); no transposes/upcasts.
    px = output_x.reshape(R, Lx)
    tx = target_x.reshape(R, Lx)
    py = output_y.reshape(R, Ly)
    ty = target_y.reshape(R, Ly)

    in_bytes = max(jnp.dtype(output_x.dtype).itemsize,
                   jnp.dtype(target_x.dtype).itemsize)
    w_bytes = jnp.dtype(target_weight.dtype).itemsize

    # Scoped-VMEM limit per generation: ~96 MiB on v5e/v6e (128 MiB physical),
    # ~48 MiB on v7x (64 MiB physical). Conservative fallback if query fails.
    try:
        vmem_cap = int(pltpu.get_tpu_info().vmem_capacity_bytes)
    except Exception:
        vmem_cap = 64 * 1024 * 1024
    vmem_limit = min(96 * 1024 * 1024, (vmem_cap * 3) // 4)

    if auto_rows:
        # Per-row footprint: double-buffered native-dtype tiles for the four
        # large streams, the sublane-padded lane-dense weight row, and ~5
        # full-width f32 temporaries materialized inside the kernel.
        bytes_per_row = (2 * 2 * (Lx + Ly) * in_bytes
                         + 2 * 8 * w_bytes
                         + 5 * max(Lx, Ly) * 4)
        budget = (vmem_limit * 6) // 10
        rows_per_block = max(32, min(1024,
                                     (budget // bytes_per_row) // 32 * 32))
    rows_per_block = min(rows_per_block, R)
    if auto_rows and rows_per_block >= R and R >= 16:
        # Keep >= 2 grid blocks so the "parallel" row axis can shard across
        # both v7x TensorCores instead of collapsing to a single block.
        rows_per_block = ((pl.cdiv(R, 2) + 7) // 8) * 8
    num_blocks = pl.cdiv(R, rows_per_block)

    # Lane-dense weight: one (1, rows_per_block) row per block, zero-padded.
    # Avoids the strided DMA / 128x lane-padded VMEM of an (R, 1) column.
    padded = num_blocks * rows_per_block
    w_flat = target_weight.reshape(R)
    if padded != R:
        w_flat = jnp.pad(w_flat, (0, padded - R))
    w2 = w_flat.reshape(num_blocks, rows_per_block)

    cost = pl.CostEstimate(
        flops=10 * R * (Lx + Ly) + 4 * R,
        transcendentals=(2 if include_target_entropy else 1) * R * (Lx + Ly),
        bytes_accessed=(R * (Lx + Ly) * (jnp.dtype(output_x.dtype).itemsize
                                         + jnp.dtype(target_x.dtype).itemsize)
                        + padded * w_bytes + num_blocks * 128 * 4),
    )

    partials = pl.pallas_call(
        functools.partial(_kld_kernel, total_rows=R,
                          include_target_entropy=include_target_entropy),
        out_shape=jax.ShapeDtypeStruct((num_blocks, 1, 128), jnp.float32),
        grid_spec=pltpu.PrefetchScalarGridSpec(
            num_scalar_prefetch=0,
            grid=(num_blocks,),
            in_specs=[
                pl.BlockSpec((rows_per_block, Lx), lambda i: (i, 0)),
                pl.BlockSpec((rows_per_block, Lx), lambda i: (i, 0)),
                pl.BlockSpec((rows_per_block, Ly), lambda i: (i, 0)),
                pl.BlockSpec((rows_per_block, Ly), lambda i: (i, 0)),
                pl.BlockSpec((1, rows_per_block), lambda i: (i, 0)),
            ],
            # TODO(synk): on v7x add pipeline_mode=pl.Buffered(3) to the four
            # large input specs if a profile shows exposed DMA at step edges.
            out_specs=pl.BlockSpec((1, 1, 128), lambda i: (i, 0, 0)),
        ),
        compiler_params=pltpu.CompilerParams(
            dimension_semantics=("parallel",),
            vmem_limit_bytes=int(vmem_limit)),
        cost_estimate=cost,
    )(px, tx, py, ty, w2)

    # Sum block partials, then the module's (1/B batch-mean)*(1/J) scaling.
    return jnp.sum(partials[:, 0, 0]) / R


def _reference_loss(output_x, output_y, target_x, target_y, target_weight):
    """Pure-JAX replica of the PyTorch module (is_3d=False), f32 math."""
    def crit(p, t):  # (B, J, L) -> (B, J)
        s = jax.nn.log_softmax(p.astype(jnp.float32), axis=-1)
        tf = t.astype(jnp.float32)
        kl = jnp.where(tf > 0, tf * jnp.log(jnp.where(tf > 0, tf, 1.0)),
                       0.0) - tf * s
        return jnp.mean(kl, axis=-1)

    J = output_x.shape[1]
    wf = target_weight.astype(jnp.float32)
    lx = jnp.mean(crit(output_x, target_x) * wf, axis=0)
    ly = jnp.mean(crit(output_y, target_y) * wf, axis=0)
    return jnp.sum(lx + ly) / J


def _check(name, got, want, rtol):
    got = float(got)
    want = float(want)
    assert abs(got - want) <= rtol * max(1.0, abs(want)), (name, got, want)


if __name__ == "__main__":
    def make_inputs(key, B, J, Lx, Ly):
        k1, k2, k3, k4, k5 = jax.random.split(key, 5)
        ox = jax.random.normal(k1, (B, J, Lx), jnp.float32)
        oy = jax.random.normal(k2, (B, J, Ly), jnp.float32)
        tx = jax.nn.softmax(2.0 * jax.random.normal(k3, (B, J, Lx)), axis=-1)
        ty = jax.nn.softmax(2.0 * jax.random.normal(k4, (B, J, Ly)), axis=-1)
        w = jax.random.uniform(k5, (B, J), jnp.float32)
        return ox, oy, tx, ty, w

    # 1) Tiny shape (single block), f32.
    ox, oy, tx, ty, w = make_inputs(jax.random.PRNGKey(0), 2, 4, 48, 64)
    loss = jax.block_until_ready(kl_discret_loss(ox, oy, tx, ty, w))
    ref = jax.block_until_ready(_reference_loss(ox, oy, tx, ty, w))
    _check("f32_single_block", loss, ref, 1e-4)

    # 2) Ragged / masked multi-block path (explicit 3-row blocks over R=8).
    loss2 = jax.block_until_ready(
        kl_discret_loss(ox, oy, tx, ty, w, rows_per_block=3))
    _check("ragged_blocks", loss2, ref, 1e-4)

    # 3) Larger R -> auto-sized >= 2 blocks (v7x dual-TC "parallel" axis), f32.
    ox3, oy3, tx3, ty3, w3 = make_inputs(jax.random.PRNGKey(1), 4, 17, 128, 128)
    loss3 = jax.block_until_ready(kl_discret_loss(ox3, oy3, tx3, ty3, w3))
    ref3 = jax.block_until_ready(_reference_loss(ox3, oy3, tx3, ty3, w3))
    _check("f32_two_blocks", loss3, ref3, 1e-4)

    # 4) bf16-streamed logits/targets (halves HBM traffic); math stays f32.
    b16 = lambda a: a.astype(jnp.bfloat16)
    loss4 = jax.block_until_ready(kl_discret_loss(
        b16(ox3), b16(oy3), b16(tx3), b16(ty3), w3))
    ref4 = jax.block_until_ready(_reference_loss(
        b16(ox3), b16(oy3), b16(tx3), b16(ty3), w3))
    _check("bf16_inputs", loss4, ref4, 1e-3)

    # 5) Grad-only mode: dropping the target-entropy term shifts the loss by a
    #    prediction-independent constant.
    loss5 = jax.block_until_ready(kl_discret_loss(
        ox3, oy3, tx3, ty3, w3, include_target_entropy=False))
    ent = lambda t: jnp.mean(
        jnp.where(t > 0, t * jnp.log(jnp.where(t > 0, t, 1.0)), 0.0), axis=-1)
    const = jnp.sum((ent(tx3) + ent(ty3)) * w3) / w3.size
    _check("no_entropy_shift", float(loss5) + float(const), loss3, 1e-3)

    print("KERNEL_OK")
</pallas_src>

<mosaic_0001>
module attributes {stable_mosaic.version = 11 : i64} {
  func.func @_kld_kernel(%arg0: i32, %arg1: memref<8x48xf32, #tpu.memory_space<vmem>>, %arg2: memref<8x48xf32, #tpu.memory_space<vmem>>, %arg3: memref<8x64xf32, #tpu.memory_space<vmem>>, %arg4: memref<8x64xf32, #tpu.memory_space<vmem>>, %arg5: memref<1x8xf32, #tpu.memory_space<vmem>>, %arg6: memref<1x1x128xf32, #tpu.memory_space<vmem>>) attributes {dimension_semantics = [#tpu.dimension_semantics<parallel>], iteration_bounds = array<i64: 1>, scalar_prefetch = 0 : i64, scratch_operands = 0 : i64, tpu.core_type = #tpu.core_type<tc>, window_params = [{transform_indices = @transform_0, window_bounds = array<i64: 8, 48>}, {transform_indices = @transform_1, window_bounds = array<i64: 8, 48>}, {transform_indices = @transform_2, window_bounds = array<i64: 8, 64>}, {transform_indices = @transform_3, window_bounds = array<i64: 8, 64>}, {transform_indices = @transform_4, window_bounds = array<i64: 1, 8>}, {transform_indices = @transform_5, window_bounds = array<i64: 1, 1, 128>}]} {
    %c0 = arith.constant 0 : index
    %c0_0 = arith.constant 0 : index
    %0 = vector.load %arg1[%c0, %c0_0] : memref<8x48xf32, #tpu.memory_space<vmem>>, vector<8x48xf32>
    %c0_1 = arith.constant 0 : index
    %c0_2 = arith.constant 0 : index
    %1 = vector.load %arg2[%c0_1, %c0_2] : memref<8x48xf32, #tpu.memory_space<vmem>>, vector<8x48xf32>
    %cst = arith.constant dense<0xFF800000> : vector<8xf32>
    %2 = vector.multi_reduction <maximumf>, %0, %cst [1] : vector<8x48xf32> to vector<8xf32>
    %3 = vector.shape_cast %2 : vector<8xf32> to vector<8x1xf32>
    %4 = vector.broadcast %3 : vector<8x1xf32> to vector<8x48xf32>
    %5 = arith.subf %0, %4 : vector<8x48xf32>
    %6 = math.exp %5 : vector<8x48xf32>
    %cst_3 = arith.constant dense<0.000000e+00> : vector<8xf32>
    %7 = vector.multi_reduction <add>, %6, %cst_3 [1] : vector<8x48xf32> to vector<8xf32>
    %8 = vector.shape_cast %7 : vector<8xf32> to vector<8x1xf32>
    %9 = math.log %8 : vector<8x1xf32>
    %10 = arith.addf %9, %3 : vector<8x1xf32>
    %cst_4 = arith.constant dense<0.000000e+00> : vector<8xf32>
    %11 = vector.multi_reduction <add>, %1, %cst_4 [1] : vector<8x48xf32> to vector<8xf32>
    %12 = vector.shape_cast %11 : vector<8xf32> to vector<8x1xf32>
    %13 = arith.mulf %1, %0 : vector<8x48xf32>
    %cst_5 = arith.constant dense<0.000000e+00> : vector<8xf32>
    %14 = vector.multi_reduction <add>, %13, %cst_5 [1] : vector<8x48xf32> to vector<8xf32>
    %15 = vector.shape_cast %14 : vector<8xf32> to vector<8x1xf32>
    %16 = arith.mulf %10, %12 : vector<8x1xf32>
    %17 = arith.subf %16, %15 : vector<8x1xf32>
    %cst_6 = arith.constant 0.000000e+00 : f32
    %18 = vector.broadcast %cst_6 : f32 to vector<8x48xf32>
    %19 = arith.cmpf ogt, %1, %18 : vector<8x48xf32>
    %cst_7 = arith.constant 0.000000e+00 : f32
    %20 = vector.broadcast %cst_7 : f32 to vector<8x48xf32>
    %21 = arith.cmpf ogt, %1, %20 : vector<8x48xf32>
    %cst_8 = arith.constant 1.000000e+00 : f32
    %22 = vector.broadcast %cst_8 : f32 to vector<8x48xf32>
    %23 = arith.select %21, %1, %22 : vector<8x48xi1>, vector<8x48xf32>
    %24 = math.log %23 : vector<8x48xf32>
    %25 = arith.mulf %1, %24 : vector<8x48xf32>
    %cst_9 = arith.constant 0.000000e+00 : f32
    %26 = vector.broadcast %cst_9 : f32 to vector<8x48xf32>
    %27 = arith.select %19, %25, %26 : vector<8x48xi1>, vector<8x48xf32>
    %cst_10 = arith.constant dense<0.000000e+00> : vector<8xf32>
    %28 = vector.multi_reduction <add>, %27, %cst_10 [1] : vector<8x48xf32> to vector<8xf32>
    %29 = vector.shape_cast %28 : vector<8xf32> to vector<8x1xf32>
    %30 = arith.addf %17, %29 : vector<8x1xf32>
    %cst_11 = arith.constant 0.020833334 : f32
    %31 = vector.broadcast %cst_11 : f32 to vector<8x1xf32>
    %32 = arith.mulf %30, %31 : vector<8x1xf32>
    %c0_12 = arith.constant 0 : index
    %c0_13 = arith.constant 0 : index
    %33 = vector.load %arg3[%c0_12, %c0_13] : memref<8x64xf32, #tpu.memory_space<vmem>>, vector<8x64xf32>
    %c0_14 = arith.constant 0 : index
    %c0_15 = arith.constant 0 : index
    %34 = vector.load %arg4[%c0_14, %c0_15] : memref<8x64xf32, #tpu.memory_space<vmem>>, vector<8x64xf32>
    %cst_16 = arith.constant dense<0xFF800000> : vector<8xf32>
    %35 = vector.multi_reduction <maximumf>, %33, %cst_16 [1] : vector<8x64xf32> to vector<8xf32>
    %36 = vector.shape_cast %35 : vector<8xf32> to vector<8x1xf32>
    %37 = vector.broadcast %36 : vector<8x1xf32> to vector<8x64xf32>
    %38 = arith.subf %33, %37 : vector<8x64xf32>
    %39 = math.exp %38 : vector<8x64xf32>
    %cst_17 = arith.constant dense<0.000000e+00> : vector<8xf32>
    %40 = vector.multi_reduction <add>, %39, %cst_17 [1] : vector<8x64xf32> to vector<8xf32>
    %41 = vector.shape_cast %40 : vector<8xf32> to vector<8x1xf32>
    %42 = math.log %41 : vector<8x1xf32>
    %43 = arith.addf %42, %36 : vector<8x1xf32>
    %cst_18 = arith.constant dense<0.000000e+00> : vector<8xf32>
    %44 = vector.multi_reduction <add>, %34, %cst_18 [1] : vector<8x64xf32> to vector<8xf32>
    %45 = vector.shape_cast %44 : vector<8xf32> to vector<8x1xf32>
    %46 = arith.mulf %34, %33 : vector<8x64xf32>
    %cst_19 = arith.constant dense<0.000000e+00> : vector<8xf32>
    %47 = vector.multi_reduction <add>, %46, %cst_19 [1] : vector<8x64xf32> to vector<8xf32>
    %48 = vector.shape_cast %47 : vector<8xf32> to vector<8x1xf32>
    %49 = arith.mulf %43, %45 : vector<8x1xf32>
    %50 = arith.subf %49, %48 : vector<8x1xf32>
    %cst_20 = arith.constant 0.000000e+00 : f32
    %51 = vector.broadcast %cst_20 : f32 to vector<8x64xf32>
    %52 = arith.cmpf ogt, %34, %51 : vector<8x64xf32>
    %cst_21 = arith.constant 0.000000e+00 : f32
    %53 = vector.broadcast %cst_21 : f32 to vector<8x64xf32>
    %54 = arith.cmpf ogt, %34, %53 : vector<8x64xf32>
    %cst_22 = arith.constant 1.000000e+00 : f32
    %55 = vector.broadcast %cst_22 : f32 to vector<8x64xf32>
    %56 = arith.select %54, %34, %55 : vector<8x64xi1>, vector<8x64xf32>
    %57 = math.log %56 : vector<8x64xf32>
    %58 = arith.mulf %34, %57 : vector<8x64xf32>
    %cst_23 = arith.constant 0.000000e+00 : f32
    %59 = vector.broadcast %cst_23 : f32 to vector<8x64xf32>
    %60 = arith.select %52, %58, %59 : vector<8x64xi1>, vector<8x64xf32>
    %cst_24 = arith.constant dense<0.000000e+00> : vector<8xf32>
    %61 = vector.multi_reduction <add>, %60, %cst_24 [1] : vector<8x64xf32> to vector<8xf32>
    %62 = vector.shape_cast %61 : vector<8xf32> to vector<8x1xf32>
    %63 = arith.addf %50, %62 : vector<8x1xf32>
    %cst_25 = arith.constant 1.562500e-02 : f32
    %64 = vector.broadcast %cst_25 : f32 to vector<8x1xf32>
    %65 = arith.mulf %63, %64 : vector<8x1xf32>
    %66 = arith.addf %32, %65 : vector<8x1xf32>
    %c0_26 = arith.constant 0 : index
    %c0_27 = arith.constant 0 : index
    %67 = vector.load %arg5[%c0_26, %c0_27] : memref<1x8xf32, #tpu.memory_space<vmem>>, vector<1x8xf32>
    %cst_28 = arith.constant dense<0.000000e+00> : vector<1x1xf32>
    %68 = tpu.matmul %67, %66, %cst_28 {dimension_numbers = #tpu.dot_dimension_numbers<[1], [0], [0], [1], [0, 0, 1, 1], [], []>} : vector<1x8xf32>, vector<8x1xf32>, vector<1x1xf32> -> vector<1x1xf32>
    %69 = vector.extract %68[0, 0] : f32 from vector<1x1xf32>
    %70 = vector.broadcast %69 : f32 to vector<1x1x128xf32>
    %c0_29 = arith.constant 0 : index
    %c0_30 = arith.constant 0 : index
    %c0_31 = arith.constant 0 : index
    %71 = vector.load %arg6[%c0_29, %c0_30, %c0_31] : memref<1x1x128xf32, #tpu.memory_space<vmem>>, vector<1x1x128xf32>
    tpu.vector_store %arg6[%c0_29, %c0_30, %c0_31], %70 {strides = array<i32>} : memref<1x1x128xf32, #tpu.memory_space<vmem>>, vector<1x1x128xf32>,
    return
  }
  func.func @transform_0(%arg0: i32) -> (i32, i32) {
    %c0_i32 = arith.constant 0 : i32
    %c0_i32_0 = arith.constant 0 : i32
    return %arg0, %c0_i32 : i32, i32
  }
  func.func @transform_1(%arg0: i32) -> (i32, i32) {
    %c0_i32 = arith.constant 0 : i32
    %c0_i32_0 = arith.constant 0 : i32
    return %arg0, %c0_i32 : i32, i32
  }
  func.func @transform_2(%arg0: i32) -> (i32, i32) {
    %c0_i32 = arith.constant 0 : i32
    %c0_i32_0 = arith.constant 0 : i32
    return %arg0, %c0_i32 : i32, i32
  }
  func.func @transform_3(%arg0: i32) -> (i32, i32) {
    %c0_i32 = arith.constant 0 : i32
    %c0_i32_0 = arith.constant 0 : i32
    return %arg0, %c0_i32 : i32, i32
  }
  func.func @transform_4(%arg0: i32) -> (i32, i32) {
    %c0_i32 = arith.constant 0 : i32
    %c0_i32_0 = arith.constant 0 : i32
    return %arg0, %c0_i32 : i32, i32
  }
  func.func @transform_5(%arg0: i32) -> (i32, i32, i32) {
    %c0_i32 = arith.constant 0 : i32
    %c0_i32_0 = arith.constant 0 : i32
    %c0_i32_1 = arith.constant 0 : i32
    return %arg0, %c0_i32, %c0_i32_0 : i32, i32, i32
  }
}

</mosaic_0001>

<bundles_post_ra>
// kernel: tpu_custom_call.1
= control target key start
LH: loop header
LB: loop body
LE: loop exit
PB: predicated region body
PF: predicated region fallthrough
CT: control target
= control target key end

     0   :  { %10 = vsyncpa [#allocation3], 0  ;;  %s445_s0 = inlined_call_operand.hbm [shape: f32[8,48], index: 0, kind: input, shape index: {}]   ;;  %s446_s1 = inlined_call_operand.hbm [shape: f32[8,48], index: 1, kind: input, shape index: {}]   ;;  %s447_s2 = inlined_call_operand.hbm [shape: f32[8,64], index: 2, kind: input, shape index: {}]   ;;  %s448_s3 = inlined_call_operand.vmem [shape: f32[8,64], index: 3, kind: input, shape index: {}]   ;;  %s449_s4 = inlined_call_operand.vmem [shape: f32[1,8], index: 4, kind: input, shape index: {}]   ;;  %s450_s5 = inlined_call_operand.hbm [shape: f32[1,1,128], index: 5, kind: output, shape index: {}]  }
   0x1   :  { %11 = vsyncpa [#allocation6], 0 }
   0x2   :  { %12 = vsyncpa [#allocation4], 0  ;;  %s343_s18 = smov [#allocation5]   ;;  %s344_s20 = smov [#allocation2]  }
   0x3   :  { %s29_s19 = sshll.u32 %s343_s18, 4  ;;  %s19_s21 = sshll.u32 %s344_s20, 4  ;;  %s30_s19 = int_to_ptr.vmem [resolvable:$true] %s29_s19  ;;  %s20_s21 = int_to_ptr.vmem [resolvable:$true] %s19_s21 }
   0x4   :  { %s249_s24 = scalar_lea.hbm %s446_s1, 128 }
   0x5   :  { %p250_p0 = scmp.ne.s32.totalorder %s446_s1, %s249_s24  ;;  %p253_p1 = scmp.lt.u32.totalorder %s249_s24, %s446_s1 }
   0x7   :  { %p255_p2 = pnand %p253_p1, %p250_p0 }
   0x9   :  { %258 = shalt.err (!%p255_p2)
}
   0xa   :  { %s259_s29 = scalar_lea.vmem %s30_s19, 128  ;;  %p264_p4 = scmp.lt.s32.totalorder %s30_s19, %s30_s19 }
   0xb   :  { %p260_p3 = scmp.ne.s32.totalorder %s30_s19, %s259_s29  ;;  %p265_p5 = scmp.lt.s32.totalorder %s259_s29, %s259_s29 }
   0xd   :  { %p266_p6 = por %p265_p5, %p264_p4 }
   0xf   :  { %p267_p7 = pnand %p266_p6, %p260_p3 }
  0x11   :  { %270 = shalt.err (!%p267_p7)
}
  0x12   :  { %32 = dma.hbm_to_vmem [thread:$0]  %s446_s1, 128, %s30_s19, [#allocation6]  }
  0x13   :  { %s271_s9 = scalar_lea.hbm %s445_s0, 128 }
  0x14   :  { %p272_p8 = scmp.ne.s32.totalorder %s445_s0, %s271_s9  ;;  %p275_p9 = scmp.lt.u32.totalorder %s271_s9, %s445_s0 }
  0x16   :  { %p277_p10 = pnand %p275_p9, %p272_p8 }
  0x18   :  { %280 = shalt.err (!%p277_p10)
}
  0x19   :  { %s281_s14 = scalar_lea.vmem %s20_s21, 128  ;;  %p286_p12 = scmp.lt.s32.totalorder %s20_s21, %s20_s21 }
  0x1a   :  { %p282_p11 = scmp.ne.s32.totalorder %s20_s21, %s281_s14  ;;  %p287_p13 = scmp.lt.s32.totalorder %s281_s14, %s281_s14 }
  0x1c   :  { %p288_p0 = por %p287_p13, %p286_p12 }
  0x1e   :  { %p289_p1 = pnand %p288_p0, %p282_p11 }
  0x20   :  { %292 = shalt.err (!%p289_p1)
}
  0x21   :  { %22 = dma.hbm_to_vmem [thread:$0]  %s445_s0, 128, %s20_s21, [#allocation3]  }
  0x22   :  { %s345_s16 = smov [#allocation7]   ;;  %s293_s20 = scalar_lea.hbm %s447_s2, 128 }
  0x23   :  { %s39_s17 = sshll.u32 %s345_s16, 4  ;;  %p294_p2 = scmp.ne.s32.totalorder %s447_s2, %s293_s20  ;;  %s40_s17 = int_to_ptr.vmem [resolvable:$true] %s39_s17 }
  0x24   :  { %p297_p3 = scmp.lt.u32.totalorder %s293_s20, %s447_s2 }
  0x26   :  { %p299_p4 = pnand %p297_p3, %p294_p2 }
  0x28   :  { %302 = shalt.err (!%p299_p4)
}
  0x29   :  { %s303_s26 = scalar_lea.vmem %s40_s17, 128  ;;  %p308_p6 = scmp.lt.s32.totalorder %s40_s17, %s40_s17 }
  0x2a   :  { %p304_p5 = scmp.ne.s32.totalorder %s40_s17, %s303_s26  ;;  %p309_p7 = scmp.lt.s32.totalorder %s303_s26, %s303_s26 }
  0x2c   :  { %p310_p8 = por %p309_p7, %p308_p6 }
  0x2e   :  { %p311_p9 = pnand %p310_p8, %p304_p5 }
  0x30   :  { %314 = shalt.err (!%p311_p9)
}
  0x31   :  { %42 = dma.hbm_to_vmem [thread:$0]  %s447_s2, 128, %s40_s17, [#allocation6]  }
  0x32   :  { %337 = dma.done.wait [#allocation3], 128  }
  0x33   :  { %338 = vsyncadd [#allocation3], 4294967168 }
  0x34   :  { %339 = dma.done.wait [#allocation6], 256  }
  0x35   :  { %340 = vsyncadd [#allocation6], 4294967040  ;;  %vm58_vm0 = vcmask 392192   ;;  %v56_v0 = vld [vmem:[#allocation2] sm:$0xff]  ;;  %v91_v1 = vld [vmem:[#allocation7] sm:$0xff]  ;;  %vm93_vm1 = vcmask 523264  }
  0x36   :  { %v59_v2 = vsel %vm58_vm0, %v56_v0, -inf  ;;  %v94_v3 = vsel %vm93_vm1, %v91_v1, -inf  ;;  %v57_v4 = vld [vmem:[#allocation5] sm:$0xff]  ;;  %v92_v14 = vld [vmem:[%s448_s3] sm:$0xff]  ;;  %v346_v34 = vmov 0.0   ;;  %vm347_vm4 = vmmov 0  }
  0x37   :  { %60 = vmax.xlane.f32.xlu0 %v59_v2  ;;  %vm80_vm2 = vcmp.gt.f32.partialorder %v57_v4, 0.0  ;;  %v71_v6 = vsel %vm58_vm0, %v57_v4, 0.0  ;;  %v74_v7 = vmul.f32 %v57_v4, %v56_v0  ;;  %vm115_vm3 = vcmp.gt.f32.partialorder %v92_v14, 0.0  ;;  %224 = vmatprep.subr.mxu0 %v346_v34  ;;  %v127_v58 = vld [vmem:[%s449_s4] sm:$0x1]  ;;  %s348_s29 = smov [#allocation8]  }
  0x38   :  { %v81_v5 = vsel %vm80_vm2, %v57_v4, 1.0  ;;  %v116_v18 = vsel %vm115_vm3, %v92_v14, 1.0  ;;  %v106_v28 = vsel %vm93_vm1, %v92_v14, 0.0  ;;  %v109_v29 = vmul.f32 %v92_v14, %v91_v1  ;;  %226 = vmatprep.mubr.msk.f32.mxu0 %vm347_vm4, %v346_v34  ;;  %s211_s30 = sshll.u32 %s348_s29, 4  ;;  %s212_s30 = int_to_ptr.vmem [resolvable:$true] %s211_s30 }
  0x39   :  { %237 = vlog2.f32 %v81_v5  ;;  %v75_v8 = vsel %vm58_vm0, %v74_v7, 0.0  ;;  %vm128_vm5 = vcmask 64512   ;;  %s315_s7 = scalar_lea.vmem %s212_s30, 16  ;;  %s319_s8 = scalar_lea.vmem %s212_s30, 32 }
  0x3a   :  { %v110_v31 = vsel %vm93_vm1, %v109_v29, 0.0  ;;  %p316_p10 = scmp.ne.s32.totalorder %s212_s30, %s315_s7  ;;  %p320_p11 = scmp.lt.s32.totalorder %s212_s30, %s212_s30 }
  0x3b   :  { %95 = vmax.xlane.f32.xlu0 %v94_v3  ;;  %p321_p12 = scmp.lt.s32.totalorder %s319_s8, %s315_s7 }
  0x3d   :  { %p322_p13 = por %p321_p12, %p320_p11 }
  0x3f   :  { %72 = vadd.xlane.f32.xlu0 %v71_v6  ;;  %p323_p0 = pnand %p322_p13, %p316_p10 }
  0x43   :  { %76 = vadd.xlane.f32.xlu0 %v75_v8  ;;  %v238_v9 = vpop.eup %237 }
  0x44   :  { %v83_v10 = vmul.f32 0.6931472, %v238_v9 }
  0x46   :  { %v84_v11 = vmul.f32 %v83_v10, %v57_v4 }
  0x48   :  { %v85_v12 = vsel %vm80_vm2, %v84_v11, 0.0 }
  0x49   :  { %v86_v13 = vsel %vm58_vm0, %v85_v12, 0.0 }
  0x4a   :  { %87 = vadd.xlane.f32.xlu0 %v86_v13 }
  0xc4   :  { %v61_v15 = vpop.xlane.xlu0 %60 }
  0xc5   :  { %v62_v16 = vsub.f32 %v56_v0, %v61_v15 }
  0xc7   :  { %v63_v17 = vmul.f32 1.442695, %v62_v16 }
  0xc8   :  { %v96_v19 = vpop.xlane.xlu0 %95 }
  0xc9   :  { %239 = vpow2.f32 %v63_v17  ;;  %v97_v20 = vsub.f32 %v91_v1, %v96_v19 }
  0xca   :  { %241 = vlog2.f32 %v116_v18 }
  0xcb   :  { %v98_v21 = vmul.f32 1.442695, %v97_v20 }
  0xcc   :  { %v73_v37 = vpop.xlane.xlu0 %72 }
  0xcd   :  { %243 = vpow2.f32 %v98_v21 }
  0xd0   :  { %v77_v41 = vpop.xlane.xlu0 %76 }
  0xd3   :  { %v240_v22 = vpop.eup %239 }
  0xd4   :  { %v242_v23 = vpop.eup %241  ;;  %v65_v24 = vsel %vm58_vm0, %v240_v22, 0.0 }
  0xd5   :  { %66 = vadd.xlane.f32.xlu1 %v65_v24  ;;  %v118_v26 = vmul.f32 0.6931472, %v242_v23 }
  0xd7   :  { %v244_v25 = vpop.eup %243  ;;  %v119_v30 = vmul.f32 %v118_v26, %v92_v14  ;;  %v88_v49 = vpop.xlane.xlu0 %87 }
  0xd8   :  { %v100_v27 = vsel %vm93_vm1, %v244_v25, 0.0 }
  0xd9   :  { %101 = vadd.xlane.f32.xlu1 %v100_v27  ;;  %v120_v32 = vsel %vm115_vm3, %v119_v30, 0.0 }
  0xda   :  { %v121_v33 = vsel %vm93_vm1, %v120_v32, 0.0 }
  0xdd   :  { %107 = vadd.xlane.f32.xlu1 %v106_v28 }
  0xe1   :  { %111 = vadd.xlane.f32.xlu1 %v110_v31 }
  0xe5   :  { %122 = vadd.xlane.f32.xlu1 %v121_v33 }
 0x162   :  { %v67_v35 = vpop.xlane.xlu1 %66 }
 0x163   :  { %245 = vlog2.f32 %v67_v35 }
 0x166   :  { %v102_v36 = vpop.xlane.xlu1 %101 }
 0x167   :  { %247 = vlog2.f32 %v102_v36 }
 0x16a   :  { %v108_v38 = vpop.xlane.xlu1 %107 }
 0x16d   :  { %v246_v39 = vpop.eup %245 }
 0x16e   :  { %v69_v40 = vmul.f32 0.6931472, %v246_v39  ;;  %v112_v44 = vpop.xlane.xlu1 %111 }
 0x170   :  { %v70_v42 = vadd.f32 %v69_v40, %v61_v15 }
 0x171   :  { %v248_v43 = vpop.eup %247 }
 0x172   :  { %v104_v45 = vmul.f32 0.6931472, %v248_v43  ;;  %v78_v46 = vmul.f32 %v73_v37, %v70_v42  ;;  %v123_v51 = vpop.xlane.xlu1 %122 }
 0x174   :  { %v105_v47 = vadd.f32 %v104_v45, %v96_v19  ;;  %v79_v48 = vsub.f32 %v78_v46, %v77_v41 }
 0x176   :  { %v113_v50 = vmul.f32 %v108_v38, %v105_v47  ;;  %v89_v53 = vadd.f32 %v88_v49, %v79_v48 }
 0x178   :  { %v114_v52 = vsub.f32 %v113_v50, %v112_v44  ;;  %v90_v55 = vmul.f32 0.020833334, %v89_v53 }
 0x17a   :  { %v124_v54 = vadd.f32 %v123_v51, %v114_v52 }
 0x17c   :  { %v125_v56 = vmul.f32 0.015625, %v124_v54 }
 0x17e   :  { %v126_v57 = vadd.f32 %v125_v56, %v90_v55 }
 0x180   :  { %225 = vmatpush3.msra.mxu0 %v126_v57 }
 0x181   :  { %227 = vmatmul.mubr.msk.f32.vlgmr.msra.gmra.mrb[0].mxu0 %vm128_vm5, %v127_v58 }
 0x254   :  { %v198_v59 = vpop.f32.mrb[0].mxu0 }
 0x255   :  { %v228_v60 = vpop.f32.mrb[1].mxu0  ;;  %229 = vpush %v198_v59 }
 0x286   :  { %s230_s6 = spop %229 }
 0x287   :  { %v203_v61 = vstv %s230_s6 }
 0x288   :  { %204 = vst [vmem:[#allocation8] sm:$0x1] %v203_v61 }
 0x289   :  { %326 = shalt.err (!%p323_p0)
}
 0x28a   :  { %s327_s10 = scalar_lea.hbm %s450_s5, 16 }
 0x28b   :  { %p328_p1 = scmp.ne.s32.totalorder %s450_s5, %s327_s10  ;;  %p331_p2 = scmp.lt.u32.totalorder %s327_s10, %s450_s5 }
 0x28d   :  { %p333_p3 = pnand %p331_p2, %p328_p1 }
 0x28f   :  { %336 = shalt.err (!%p333_p3)
}
 0x290   :  { %214 = dma.vmem_to_hbm [thread:$0]  %s212_s30, 16, %s450_s5, [#allocation4]  }
 0x291   :  { %341 = dma.done.wait [#allocation4], 16  }
 0x292   :  { %342 = vsyncadd [#allocation4], 4294967280 }
 0x293   :  { %218 = vsyncpa [#allocation3], 1 }
 0x294   :  { %219 = vsyncpa [#allocation6], 1 }
 0x295   :  { %220 = vsyncpa [#allocation4], 1 }

</bundles_post_ra>
